<compile_context>
chip_gen: v7x
topology: tpu7x:2x2x1
jax: 0.10.0
libtpu: 0.0.40
codegen_flags: <defaults>
</compile_context>

<pallas_src>
import jax
import jax.numpy as jnp
from jax.experimental import pallas as pl
from jax.experimental.pallas import tpu as pltpu


# ---------------------------------------------------------------------------
# Tunables
# ---------------------------------------------------------------------------
# Below this many input bytes the standalone kernel is a net loss -> XLA cast.
_MIN_PALLAS_IN_BYTES = 256 * 1024
# Target (input block + output block) bytes per grid step (~12 MiB resident
# with default double buffering; fits every generation's scoped-VMEM default).
_BLOCK_PAIR_BYTES = 6 * 1024 * 1024
# Above this many total (in+out) bytes, force >= 2 grid blocks (v7x 2-TC).
_MIN_SPLIT_BYTES = 2 * 1024 * 1024
# Lane widths to try for the lane-dense view (largest first, all % 128 == 0).
_LANE_CANDIDATES = (8192, 4096, 2048, 1024, 512, 256, 128)
# Sublane alignment of the row tile, keyed by input itemsize (f32/i32, bf16, i8).
_SUBLANE_ALIGN = {4: 8, 2: 16, 1: 32}


def _cast_copy_kernel(x_ref, o_ref):
    # Elementwise hot path: load tile, cast to float32, store (lane-dense).
    o_ref[...] = x_ref[...].astype(o_ref.dtype)


def _choose_lane(n: int):
    """Largest lane width (multiple of 128) that evenly divides n, or None."""
    for lane in _LANE_CANDIDATES:
        if n % lane == 0:
            return lane
    return None


def _choose_row_tile(rows: int, lane: int, in_itemsize: int) -> int:
    """Sublane-aligned row tile within the VMEM budget; >=2 blocks when large."""
    align = _SUBLANE_ALIGN.get(in_itemsize, 8)
    pair_bytes_per_row = lane * (in_itemsize + 4)
    budget_rows = max(1, _BLOCK_PAIR_BYTES // pair_bytes_per_row)
    tr = min(rows, budget_rows)

    # v7x core-aware split: keep at least 2 parallel grid blocks when the copy
    # is big enough for the split to matter.
    total_pair_bytes = rows * pair_bytes_per_row
    if total_pair_bytes >= _MIN_SPLIT_BYTES and rows >= 2 * align:
        tr = min(tr, (rows + 1) // 2)

    if tr < rows:
        # Block's second-to-last dim must be a multiple of the sublane tile
        # (or equal the full dim); round down, never above the full extent.
        tr = max(align, (tr // align) * align)
        tr = min(tr, rows)
    return tr


def _pallas_cast_to_f32_lane_dense(flat: jax.Array, lane: int) -> jax.Array:
    """Cast a flat (len % lane == 0) array to float32 via a lane-dense 2-D kernel."""
    n = flat.shape[0]
    rows = n // lane
    in_itemsize = jnp.dtype(flat.dtype).itemsize

    x2d = flat.reshape(rows, lane)  # metadata-only for a contiguous array
    tr = _choose_row_tile(rows, lane, in_itemsize)
    grid = (pl.cdiv(rows, tr),)

    spec = pl.BlockSpec((tr, lane), lambda i: (i, 0))
    y2d = pl.pallas_call(
        _cast_copy_kernel,
        out_shape=jax.ShapeDtypeStruct((rows, lane), jnp.float32),
        grid=grid,
        in_specs=[spec],
        out_specs=spec,
        compiler_params=pltpu.CompilerParams(
            # Only matters on multi-TC chips (v7x); harmless elsewhere.
            dimension_semantics=("parallel",),
        ),
        cost_estimate=pl.CostEstimate(
            flops=0,
            transcendentals=0,
            bytes_accessed=n * (in_itemsize + 4),
        ),
    )(x2d)
    return y2d.reshape(n)


def critic_forward(state: jax.Array) -> jax.Array:
    """JAX/Pallas equivalent of CriticModel.forward.

    Args:
        state: environment state, shape [C, H, W] (any numeric dtype).

    Returns:
        critic: float32 tensor of shape [1, C, H, W] (identity of the input
        with a batch dim prepended), matching the PyTorch preprocessor.
    """
    if state.dtype == jnp.float32:
        # Already float32: expand_dims is metadata-only; a copy kernel would
        # be a pure HBM round-trip for zero work.
        return state[None, ...]

    n = int(state.size)
    in_bytes = n * jnp.dtype(state.dtype).itemsize

    if in_bytes < _MIN_PALLAS_IN_BYTES:
        # Small state: launch overhead dominates; let XLA fuse the convert
        # into whatever consumes the critic input.
        return state.astype(jnp.float32)[None, ...]

    lane = _choose_lane(n)
    if lane is None:
        # Not cleanly factorable into a lane-dense (rows, k*128) view: a masked
        # Pallas copy would be slower than the fused XLA convert for this
        # memory-bound op, so fall back.
        return state.astype(jnp.float32)[None, ...]

    flat = state.reshape(-1)  # metadata-only for a contiguous array
    y = _pallas_cast_to_f32_lane_dense(flat, lane)
    return y.reshape(state.shape)[None, ...]


if __name__ == "__main__":
    key = jax.random.PRNGKey(0)

    # 1) Small environment state [C, H, W]: below threshold -> fused XLA cast.
    state_small = jax.random.normal(key, (4, 16, 16), dtype=jnp.bfloat16)
    critic_small = critic_forward(state_small)
    jax.block_until_ready(critic_small)
    assert critic_small.shape == (1, 4, 16, 16), critic_small.shape
    assert critic_small.dtype == jnp.float32, critic_small.dtype
    assert bool(
        jnp.array_equal(critic_small, state_small.astype(jnp.float32)[None, ...])
    ), "mismatch vs reference (small / XLA path)"

    # 2) Larger state: exercises the lane-dense Pallas cast kernel.
    state_large = jax.random.normal(key, (16, 128, 128), dtype=jnp.bfloat16)
    critic_large = critic_forward(state_large)
    jax.block_until_ready(critic_large)
    assert critic_large.shape == (1, 16, 128, 128), critic_large.shape
    assert critic_large.dtype == jnp.float32, critic_large.dtype
    assert bool(
        jnp.array_equal(critic_large, state_large.astype(jnp.float32)[None, ...])
    ), "mismatch vs reference (large / Pallas path)"

    # 3) float32 input short-circuits everything (metadata-only expand_dims).
    state_f32 = jax.random.normal(key, (4, 16, 16), dtype=jnp.float32)
    critic_f32 = critic_forward(state_f32)
    jax.block_until_ready(critic_f32)
    assert critic_f32.shape == (1, 4, 16, 16), critic_f32.shape
    assert critic_f32.dtype == jnp.float32, critic_f32.dtype
    assert bool(
        jnp.array_equal(critic_f32, state_f32[None, ...])
    ), "mismatch (f32 short-circuit path)"

    print("KERNEL_OK")
</pallas_src>

<mosaic_0001>
module attributes {stable_mosaic.version = 11 : i64} {
  func.func @_cast_copy_kernel(%arg0: i32, %arg1: memref<32x8192xbf16, #tpu.memory_space<vmem>>, %arg2: memref<32x8192xf32, #tpu.memory_space<vmem>>) attributes {dimension_semantics = [#tpu.dimension_semantics<parallel>], iteration_bounds = array<i64: 1>, scalar_prefetch = 0 : i64, scratch_operands = 0 : i64, tpu.core_type = #tpu.core_type<tc>, window_params = [{transform_indices = @transform_0, window_bounds = array<i64: 32, 8192>}, {transform_indices = @transform_1, window_bounds = array<i64: 32, 8192>}]} {
    %c0 = arith.constant 0 : index
    %c0_0 = arith.constant 0 : index
    %0 = vector.load %arg1[%c0, %c0_0] : memref<32x8192xbf16, #tpu.memory_space<vmem>>, vector<32x8192xbf16>
    %1 = arith.extf %0 : vector<32x8192xbf16> to vector<32x8192xf32>
    %c0_1 = arith.constant 0 : index
    %c0_2 = arith.constant 0 : index
    %2 = vector.load %arg2[%c0_1, %c0_2] : memref<32x8192xf32, #tpu.memory_space<vmem>>, vector<32x8192xf32>
    tpu.vector_store %arg2[%c0_1, %c0_2], %1 {strides = array<i32>} : memref<32x8192xf32, #tpu.memory_space<vmem>>, vector<32x8192xf32>,
    return
  }
  func.func @transform_0(%arg0: i32) -> (i32, i32) {
    %c0_i32 = arith.constant 0 : i32
    %c0_i32_0 = arith.constant 0 : i32
    return %arg0, %c0_i32 : i32, i32
  }
  func.func @transform_1(%arg0: i32) -> (i32, i32) {
    %c0_i32 = arith.constant 0 : i32
    %c0_i32_0 = arith.constant 0 : i32
    return %arg0, %c0_i32 : i32, i32
  }
}

</mosaic_0001>

<bundles_post_ra>
// kernel: tpu_custom_call.1
= control target key start
LH: loop header
LB: loop body
LE: loop exit
PB: predicated region body
PF: predicated region fallthrough
CT: control target
= control target key end

     0   :  { %6 = vsyncpa [#allocation3], 0  ;;  %s774_s0 = inlined_call_operand.hbm [shape: bf16[32,8192], index: 0, kind: input, shape index: {}]   ;;  %s775_s1 = inlined_call_operand.hbm [shape: f32[32,8192], index: 1, kind: output, shape index: {}]  }
   0x1   :  { %7 = vsyncpa [#allocation4], 0  ;;  %s734_s6 = smov [#allocation2]   ;;  %s686_s10 = scalar_lea.hbm %s774_s0, 16384 }
   0x2   :  { %s13_s7 = sshll.u32 %s734_s6, 4  ;;  %p687_p0 = scmp.ne.s32.totalorder %s774_s0, %s686_s10  ;;  %s14_s7 = int_to_ptr.vmem [resolvable:$true] %s13_s7 }
   0x3   :  { %p690_p1 = scmp.lt.u32.totalorder %s686_s10, %s774_s0 }
   0x5   :  { %p692_p2 = pnand %p690_p1, %p687_p0 }
   0x7   :  { %695 = shalt.err (!%p692_p2)
}
   0x8   :  { %s696_s15 = scalar_lea.vmem %s14_s7, 16384  ;;  %p701_p4 = scmp.lt.s32.totalorder %s14_s7, %s14_s7 }
   0x9   :  { %p697_p3 = scmp.ne.s32.totalorder %s14_s7, %s696_s15  ;;  %p702_p5 = scmp.lt.s32.totalorder %s696_s15, %s696_s15 }
   0xb   :  { %p703_p6 = por %p702_p5, %p701_p4 }
   0xd   :  { %p704_p7 = pnand %p703_p6, %p697_p3 }
   0xf   :  { %707 = shalt.err (!%p704_p7)
}
  0x10   :  { %s735_s16 = smov 4096   ;;  %s736_s17 = smov 256  }
  0x11   :  { %19 = dma.hbm_to_vmem [thread:$0]  %s774_s0, 16384, %s14_s7, [#allocation3], %s735_s16, %s735_s16, %s736_s17  }
  0x12   :  { %730 = dma.done.wait [#allocation3], 16384  }
  0x13   :  { %731 = vsyncadd [#allocation3], 4294950912  ;;  %v23_v0 = vld [vmem:[#allocation2] sm:$0xff]  ;;  %v24_v1 = vld [vmem:[#allocation2 + $0x8] sm:$0xff]  ;;  %s737_s0 = smov [#allocation5]  }
  0x14   :  { %v25_v2 = vld [vmem:[#allocation2 + $0x10] sm:$0xff]  ;;  %v151_v3 = vunpack.c.l.bf16 %v23_v0  ;;  %v152_v4 = vunpack.c.h.bf16 %v23_v0  ;;  %v153_v5 = vunpack.c.l.bf16 %v24_v1  ;;  %v154_v6 = vunpack.c.h.bf16 %v24_v1  ;;  %v26_v7 = vld [vmem:[#allocation2 + $0x18] sm:$0xff]  ;;  %v27_v8 = vld [vmem:[#allocation2 + $0x20] sm:$0xff]  ;;  %s668_s20 = sshll.u32 %s737_s0, 4  ;;  %s669_s20 = int_to_ptr.vmem [resolvable:$true] %s668_s20 }
  0x15   :  { %v28_v9 = vld [vmem:[#allocation2 + $0x28] sm:$0xff]  ;;  %v155_v10 = vunpack.c.l.bf16 %v25_v2  ;;  %v156_v11 = vunpack.c.h.bf16 %v25_v2  ;;  %v157_v12 = vunpack.c.l.bf16 %v26_v7  ;;  %v158_v13 = vunpack.c.h.bf16 %v26_v7  ;;  %v29_v14 = vld [vmem:[#allocation2 + $0x30] sm:$0xff]  ;;  %v30_v15 = vld [vmem:[#allocation2 + $0x38] sm:$0xff]  ;;  %s708_s21 = scalar_lea.vmem %s669_s20, 32768  ;;  %p713_p9 = scmp.lt.s32.totalorder %s669_s20, %s669_s20 }
  0x16   :  { %v31_v16 = vld [vmem:[#allocation2 + $0x40] sm:$0xff]  ;;  %407 = vst [vmem:[#allocation5] sm:$0xff] %v151_v3  ;;  %408 = vst [vmem:[#allocation5 + $0x8] sm:$0xff] %v152_v4  ;;  %v159_v17 = vunpack.c.l.bf16 %v27_v8  ;;  %v160_v18 = vunpack.c.h.bf16 %v27_v8  ;;  %v161_v19 = vunpack.c.l.bf16 %v28_v9  ;;  %v162_v20 = vunpack.c.h.bf16 %v28_v9  ;;  %v32_v21 = vld [vmem:[#allocation2 + $0x48] sm:$0xff]  ;;  %p709_p8 = scmp.ne.s32.totalorder %s669_s20, %s708_s21  ;;  %p714_p10 = scmp.lt.s32.totalorder %s708_s21, %s708_s21 }
  0x17   :  { %409 = vst [vmem:[#allocation5 + $0x10] sm:$0xff] %v153_v5  ;;  %410 = vst [vmem:[#allocation5 + $0x18] sm:$0xff] %v154_v6  ;;  %v33_v22 = vld [vmem:[#allocation2 + $0x50] sm:$0xff]  ;;  %v34_v23 = vld [vmem:[#allocation2 + $0x58] sm:$0xff]  ;;  %v163_v24 = vunpack.c.l.bf16 %v29_v14  ;;  %v164_v25 = vunpack.c.h.bf16 %v29_v14  ;;  %v165_v26 = vunpack.c.l.bf16 %v30_v15  ;;  %v166_v27 = vunpack.c.h.bf16 %v30_v15 }
  0x18   :  { %411 = vst [vmem:[#allocation5 + $0x20] sm:$0xff] %v155_v10  ;;  %412 = vst [vmem:[#allocation5 + $0x28] sm:$0xff] %v156_v11  ;;  %v35_v28 = vld [vmem:[#allocation2 + $0x60] sm:$0xff]  ;;  %v36_v29 = vld [vmem:[#allocation2 + $0x68] sm:$0xff]  ;;  %v167_v30 = vunpack.c.l.bf16 %v31_v16  ;;  %v168_v31 = vunpack.c.h.bf16 %v31_v16  ;;  %v169_v32 = vunpack.c.l.bf16 %v32_v21  ;;  %v170_v33 = vunpack.c.h.bf16 %v32_v21  ;;  %p715_p11 = por %p714_p10, %p713_p9 }
  0x19   :  { %413 = vst [vmem:[#allocation5 + $0x30] sm:$0xff] %v157_v12  ;;  %414 = vst [vmem:[#allocation5 + $0x38] sm:$0xff] %v158_v13  ;;  %v37_v34 = vld [vmem:[#allocation2 + $0x70] sm:$0xff]  ;;  %v38_v35 = vld [vmem:[#allocation2 + $0x78] sm:$0xff]  ;;  %v171_v36 = vunpack.c.l.bf16 %v33_v22  ;;  %v172_v37 = vunpack.c.h.bf16 %v33_v22  ;;  %v173_v38 = vunpack.c.l.bf16 %v34_v23  ;;  %v174_v39 = vunpack.c.h.bf16 %v34_v23 }
  0x1a   :  { %415 = vst [vmem:[#allocation5 + $0x40] sm:$0xff] %v159_v17  ;;  %416 = vst [vmem:[#allocation5 + $0x48] sm:$0xff] %v160_v18  ;;  %v39_v40 = vld [vmem:[#allocation2 + $0x80] sm:$0xff]  ;;  %v40_v41 = vld [vmem:[#allocation2 + $0x88] sm:$0xff]  ;;  %v175_v42 = vunpack.c.l.bf16 %v35_v28  ;;  %v176_v43 = vunpack.c.h.bf16 %v35_v28  ;;  %v177_v44 = vunpack.c.l.bf16 %v36_v29  ;;  %v178_v45 = vunpack.c.h.bf16 %v36_v29  ;;  %p716_p12 = pnand %p715_p11, %p709_p8 }
  0x1b   :  { %417 = vst [vmem:[#allocation5 + $0x50] sm:$0xff] %v161_v19  ;;  %418 = vst [vmem:[#allocation5 + $0x58] sm:$0xff] %v162_v20  ;;  %v41_v46 = vld [vmem:[#allocation2 + $0x90] sm:$0xff]  ;;  %v42_v47 = vld [vmem:[#allocation2 + $0x98] sm:$0xff]  ;;  %v179_v48 = vunpack.c.l.bf16 %v37_v34  ;;  %v180_v49 = vunpack.c.h.bf16 %v37_v34  ;;  %v181_v50 = vunpack.c.l.bf16 %v38_v35  ;;  %v182_v51 = vunpack.c.h.bf16 %v38_v35 }
  0x1c   :  { %419 = vst [vmem:[#allocation5 + $0x60] sm:$0xff] %v163_v24  ;;  %420 = vst [vmem:[#allocation5 + $0x68] sm:$0xff] %v164_v25  ;;  %v43_v52 = vld [vmem:[#allocation2 + $0xa0] sm:$0xff]  ;;  %v44_v53 = vld [vmem:[#allocation2 + $0xa8] sm:$0xff]  ;;  %v183_v54 = vunpack.c.l.bf16 %v39_v40  ;;  %v184_v55 = vunpack.c.h.bf16 %v39_v40  ;;  %v185_v56 = vunpack.c.l.bf16 %v40_v41  ;;  %v186_v57 = vunpack.c.h.bf16 %v40_v41 }
  0x1d   :  { %421 = vst [vmem:[#allocation5 + $0x70] sm:$0xff] %v165_v26  ;;  %422 = vst [vmem:[#allocation5 + $0x78] sm:$0xff] %v166_v27  ;;  %v45_v58 = vld [vmem:[#allocation2 + $0xb0] sm:$0xff]  ;;  %v46_v59 = vld [vmem:[#allocation2 + $0xb8] sm:$0xff]  ;;  %v187_v60 = vunpack.c.l.bf16 %v41_v46  ;;  %v188_v61 = vunpack.c.h.bf16 %v41_v46  ;;  %v189_v62 = vunpack.c.l.bf16 %v42_v47  ;;  %v190_v63 = vunpack.c.h.bf16 %v42_v47 }
  0x1e   :  { %423 = vst [vmem:[#allocation5 + $0x80] sm:$0xff] %v167_v30  ;;  %424 = vst [vmem:[#allocation5 + $0x88] sm:$0xff] %v168_v31  ;;  %v47_v0 = vld [vmem:[#allocation2 + $0xc0] sm:$0xff]  ;;  %v48_v1 = vld [vmem:[#allocation2 + $0xc8] sm:$0xff]  ;;  %v191_v2 = vunpack.c.l.bf16 %v43_v52  ;;  %v192_v3 = vunpack.c.h.bf16 %v43_v52  ;;  %v193_v4 = vunpack.c.l.bf16 %v44_v53  ;;  %v194_v5 = vunpack.c.h.bf16 %v44_v53 }
  0x1f   :  { %425 = vst [vmem:[#allocation5 + $0x90] sm:$0xff] %v169_v32  ;;  %426 = vst [vmem:[#allocation5 + $0x98] sm:$0xff] %v170_v33  ;;  %v49_v6 = vld [vmem:[#allocation2 + $0xd0] sm:$0xff]  ;;  %v50_v7 = vld [vmem:[#allocation2 + $0xd8] sm:$0xff]  ;;  %v195_v8 = vunpack.c.l.bf16 %v45_v58  ;;  %v196_v9 = vunpack.c.h.bf16 %v45_v58  ;;  %v197_v10 = vunpack.c.l.bf16 %v46_v59  ;;  %v198_v11 = vunpack.c.h.bf16 %v46_v59 }
  0x20   :  { %427 = vst [vmem:[#allocation5 + $0xa0] sm:$0xff] %v171_v36  ;;  %428 = vst [vmem:[#allocation5 + $0xa8] sm:$0xff] %v172_v37  ;;  %v51_v12 = vld [vmem:[#allocation2 + $0xe0] sm:$0xff]  ;;  %v52_v13 = vld [vmem:[#allocation2 + $0xe8] sm:$0xff]  ;;  %v199_v14 = vunpack.c.l.bf16 %v47_v0  ;;  %v200_v15 = vunpack.c.h.bf16 %v47_v0  ;;  %v201_v16 = vunpack.c.l.bf16 %v48_v1  ;;  %v202_v17 = vunpack.c.h.bf16 %v48_v1 }
  0x21   :  { %429 = vst [vmem:[#allocation5 + $0xb0] sm:$0xff] %v173_v38  ;;  %430 = vst [vmem:[#allocation5 + $0xb8] sm:$0xff] %v174_v39  ;;  %v53_v18 = vld [vmem:[#allocation2 + $0xf0] sm:$0xff]  ;;  %v54_v19 = vld [vmem:[#allocation2 + $0xf8] sm:$0xff]  ;;  %v203_v20 = vunpack.c.l.bf16 %v49_v6  ;;  %v204_v21 = vunpack.c.h.bf16 %v49_v6  ;;  %v205_v22 = vunpack.c.l.bf16 %v50_v7  ;;  %v206_v23 = vunpack.c.h.bf16 %v50_v7 }
  0x22   :  { %431 = vst [vmem:[#allocation5 + $0xc0] sm:$0xff] %v175_v42  ;;  %432 = vst [vmem:[#allocation5 + $0xc8] sm:$0xff] %v176_v43  ;;  %v55_v24 = vld [vmem:[#allocation2 + $0x100] sm:$0xff]  ;;  %v56_v25 = vld [vmem:[#allocation2 + $0x108] sm:$0xff]  ;;  %v207_v26 = vunpack.c.l.bf16 %v51_v12  ;;  %v208_v27 = vunpack.c.h.bf16 %v51_v12  ;;  %v209_v28 = vunpack.c.l.bf16 %v52_v13  ;;  %v210_v29 = vunpack.c.h.bf16 %v52_v13 }
  0x23   :  { %433 = vst [vmem:[#allocation5 + $0xd0] sm:$0xff] %v177_v44  ;;  %434 = vst [vmem:[#allocation5 + $0xd8] sm:$0xff] %v178_v45  ;;  %v57_v30 = vld [vmem:[#allocation2 + $0x110] sm:$0xff]  ;;  %v58_v31 = vld [vmem:[#allocation2 + $0x118] sm:$0xff]  ;;  %v211_v32 = vunpack.c.l.bf16 %v53_v18  ;;  %v212_v33 = vunpack.c.h.bf16 %v53_v18  ;;  %v213_v34 = vunpack.c.l.bf16 %v54_v19  ;;  %v214_v35 = vunpack.c.h.bf16 %v54_v19 }
  0x24   :  { %435 = vst [vmem:[#allocation5 + $0xe0] sm:$0xff] %v179_v48  ;;  %436 = vst [vmem:[#allocation5 + $0xe8] sm:$0xff] %v180_v49  ;;  %v59_v36 = vld [vmem:[#allocation2 + $0x120] sm:$0xff]  ;;  %v60_v37 = vld [vmem:[#allocation2 + $0x128] sm:$0xff]  ;;  %v215_v38 = vunpack.c.l.bf16 %v55_v24  ;;  %v216_v39 = vunpack.c.h.bf16 %v55_v24  ;;  %v217_v40 = vunpack.c.l.bf16 %v56_v25  ;;  %v218_v41 = vunpack.c.h.bf16 %v56_v25 }
  0x25   :  { %437 = vst [vmem:[#allocation5 + $0xf0] sm:$0xff] %v181_v50  ;;  %438 = vst [vmem:[#allocation5 + $0xf8] sm:$0xff] %v182_v51  ;;  %v61_v42 = vld [vmem:[#allocation2 + $0x130] sm:$0xff]  ;;  %v62_v43 = vld [vmem:[#allocation2 + $0x138] sm:$0xff]  ;;  %v219_v44 = vunpack.c.l.bf16 %v57_v30  ;;  %v220_v45 = vunpack.c.h.bf16 %v57_v30  ;;  %v221_v46 = vunpack.c.l.bf16 %v58_v31  ;;  %v222_v47 = vunpack.c.h.bf16 %v58_v31 }
  0x26   :  { %439 = vst [vmem:[#allocation5 + $0x100] sm:$0xff] %v183_v54  ;;  %440 = vst [vmem:[#allocation5 + $0x108] sm:$0xff] %v184_v55  ;;  %v63_v48 = vld [vmem:[#allocation2 + $0x140] sm:$0xff]  ;;  %v64_v49 = vld [vmem:[#allocation2 + $0x148] sm:$0xff]  ;;  %v223_v50 = vunpack.c.l.bf16 %v59_v36  ;;  %v224_v51 = vunpack.c.h.bf16 %v59_v36  ;;  %v225_v52 = vunpack.c.l.bf16 %v60_v37  ;;  %v226_v53 = vunpack.c.h.bf16 %v60_v37 }
  0x27   :  { %441 = vst [vmem:[#allocation5 + $0x110] sm:$0xff] %v185_v56  ;;  %442 = vst [vmem:[#allocation5 + $0x118] sm:$0xff] %v186_v57  ;;  %v65_v54 = vld [vmem:[#allocation2 + $0x150] sm:$0xff]  ;;  %v66_v55 = vld [vmem:[#allocation2 + $0x158] sm:$0xff]  ;;  %v227_v56 = vunpack.c.l.bf16 %v61_v42  ;;  %v228_v57 = vunpack.c.h.bf16 %v61_v42  ;;  %v229_v58 = vunpack.c.l.bf16 %v62_v43  ;;  %v230_v59 = vunpack.c.h.bf16 %v62_v43 }
  0x28   :  { %443 = vst [vmem:[#allocation5 + $0x120] sm:$0xff] %v187_v60  ;;  %444 = vst [vmem:[#allocation5 + $0x128] sm:$0xff] %v188_v61  ;;  %v67_v60 = vld [vmem:[#allocation2 + $0x160] sm:$0xff]  ;;  %v68_v61 = vld [vmem:[#allocation2 + $0x168] sm:$0xff]  ;;  %v233_v0 = vunpack.c.l.bf16 %v64_v49  ;;  %v234_v1 = vunpack.c.h.bf16 %v64_v49  ;;  %v237_v6 = vunpack.c.l.bf16 %v66_v55  ;;  %v238_v7 = vunpack.c.h.bf16 %v66_v55 }
  0x29   :  { %445 = vst [vmem:[#allocation5 + $0x130] sm:$0xff] %v189_v62  ;;  %446 = vst [vmem:[#allocation5 + $0x138] sm:$0xff] %v190_v63  ;;  %v231_v62 = vunpack.c.l.bf16 %v63_v48  ;;  %v232_v63 = vunpack.c.h.bf16 %v63_v48  ;;  %v241_v12 = vunpack.c.l.bf16 %v68_v61  ;;  %v242_v13 = vunpack.c.h.bf16 %v68_v61 }
  0x2a   :  { %447 = vst [vmem:[#allocation5 + $0x140] sm:$0xff] %v191_v2  ;;  %448 = vst [vmem:[#allocation5 + $0x148] sm:$0xff] %v192_v3  ;;  %v69_v2 = vld [vmem:[#allocation2 + $0x170] sm:$0xff]  ;;  %v70_v3 = vld [vmem:[#allocation2 + $0x178] sm:$0xff] }
  0x2b   :  { %449 = vst [vmem:[#allocation5 + $0x150] sm:$0xff] %v193_v4  ;;  %450 = vst [vmem:[#allocation5 + $0x158] sm:$0xff] %v194_v5  ;;  %v235_v4 = vunpack.c.l.bf16 %v65_v54  ;;  %v236_v5 = vunpack.c.h.bf16 %v65_v54  ;;  %v245_v18 = vunpack.c.l.bf16 %v70_v3  ;;  %v246_v19 = vunpack.c.h.bf16 %v70_v3 }
  0x2c   :  { %451 = vst [vmem:[#allocation5 + $0x160] sm:$0xff] %v195_v8  ;;  %452 = vst [vmem:[#allocation5 + $0x168] sm:$0xff] %v196_v9  ;;  %v71_v8 = vld [vmem:[#allocation2 + $0x180] sm:$0xff]  ;;  %v72_v9 = vld [vmem:[#allocation2 + $0x188] sm:$0xff] }
  0x2d   :  { %453 = vst [vmem:[#allocation5 + $0x170] sm:$0xff] %v197_v10  ;;  %454 = vst [vmem:[#allocation5 + $0x178] sm:$0xff] %v198_v11  ;;  %v239_v10 = vunpack.c.l.bf16 %v67_v60  ;;  %v240_v11 = vunpack.c.h.bf16 %v67_v60  ;;  %v249_v24 = vunpack.c.l.bf16 %v72_v9  ;;  %v250_v25 = vunpack.c.h.bf16 %v72_v9 }
  0x2e   :  { %455 = vst [vmem:[#allocation5 + $0x180] sm:$0xff] %v199_v14  ;;  %456 = vst [vmem:[#allocation5 + $0x188] sm:$0xff] %v200_v15  ;;  %v73_v14 = vld [vmem:[#allocation2 + $0x190] sm:$0xff]  ;;  %v74_v15 = vld [vmem:[#allocation2 + $0x198] sm:$0xff] }
  0x2f   :  { %457 = vst [vmem:[#allocation5 + $0x190] sm:$0xff] %v201_v16  ;;  %458 = vst [vmem:[#allocation5 + $0x198] sm:$0xff] %v202_v17  ;;  %v243_v16 = vunpack.c.l.bf16 %v69_v2  ;;  %v244_v17 = vunpack.c.h.bf16 %v69_v2  ;;  %v253_v30 = vunpack.c.l.bf16 %v74_v15  ;;  %v254_v31 = vunpack.c.h.bf16 %v74_v15 }
  0x30   :  { %459 = vst [vmem:[#allocation5 + $0x1a0] sm:$0xff] %v203_v20  ;;  %460 = vst [vmem:[#allocation5 + $0x1a8] sm:$0xff] %v204_v21  ;;  %v75_v20 = vld [vmem:[#allocation2 + $0x1a0] sm:$0xff]  ;;  %v76_v21 = vld [vmem:[#allocation2 + $0x1a8] sm:$0xff] }
  0x31   :  { %461 = vst [vmem:[#allocation5 + $0x1b0] sm:$0xff] %v205_v22  ;;  %462 = vst [vmem:[#allocation5 + $0x1b8] sm:$0xff] %v206_v23  ;;  %v247_v22 = vunpack.c.l.bf16 %v71_v8  ;;  %v248_v23 = vunpack.c.h.bf16 %v71_v8  ;;  %v257_v36 = vunpack.c.l.bf16 %v76_v21  ;;  %v258_v37 = vunpack.c.h.bf16 %v76_v21 }
  0x32   :  { %463 = vst [vmem:[#allocation5 + $0x1c0] sm:$0xff] %v207_v26  ;;  %464 = vst [vmem:[#allocation5 + $0x1c8] sm:$0xff] %v208_v27  ;;  %v77_v26 = vld [vmem:[#allocation2 + $0x1b0] sm:$0xff]  ;;  %v78_v27 = vld [vmem:[#allocation2 + $0x1b8] sm:$0xff] }
  0x33   :  { %465 = vst [vmem:[#allocation5 + $0x1d0] sm:$0xff] %v209_v28  ;;  %466 = vst [vmem:[#allocation5 + $0x1d8] sm:$0xff] %v210_v29  ;;  %v251_v28 = vunpack.c.l.bf16 %v73_v14  ;;  %v252_v29 = vunpack.c.h.bf16 %v73_v14  ;;  %v261_v42 = vunpack.c.l.bf16 %v78_v27  ;;  %v262_v43 = vunpack.c.h.bf16 %v78_v27 }
  0x34   :  { %467 = vst [vmem:[#allocation5 + $0x1e0] sm:$0xff] %v211_v32  ;;  %468 = vst [vmem:[#allocation5 + $0x1e8] sm:$0xff] %v212_v33  ;;  %v79_v32 = vld [vmem:[#allocation2 + $0x1c0] sm:$0xff]  ;;  %v80_v33 = vld [vmem:[#allocation2 + $0x1c8] sm:$0xff] }
  0x35   :  { %469 = vst [vmem:[#allocation5 + $0x1f0] sm:$0xff] %v213_v34  ;;  %470 = vst [vmem:[#allocation5 + $0x1f8] sm:$0xff] %v214_v35  ;;  %v255_v34 = vunpack.c.l.bf16 %v75_v20  ;;  %v256_v35 = vunpack.c.h.bf16 %v75_v20  ;;  %v265_v48 = vunpack.c.l.bf16 %v80_v33  ;;  %v266_v49 = vunpack.c.h.bf16 %v80_v33 }
  0x36   :  { %471 = vst [vmem:[#allocation5 + $0x200] sm:$0xff] %v215_v38  ;;  %472 = vst [vmem:[#allocation5 + $0x208] sm:$0xff] %v216_v39  ;;  %v81_v38 = vld [vmem:[#allocation2 + $0x1d0] sm:$0xff]  ;;  %v82_v39 = vld [vmem:[#allocation2 + $0x1d8] sm:$0xff] }
  0x37   :  { %473 = vst [vmem:[#allocation5 + $0x210] sm:$0xff] %v217_v40  ;;  %474 = vst [vmem:[#allocation5 + $0x218] sm:$0xff] %v218_v41  ;;  %v259_v40 = vunpack.c.l.bf16 %v77_v26  ;;  %v260_v41 = vunpack.c.h.bf16 %v77_v26  ;;  %v269_v54 = vunpack.c.l.bf16 %v82_v39  ;;  %v270_v55 = vunpack.c.h.bf16 %v82_v39 }
  0x38   :  { %475 = vst [vmem:[#allocation5 + $0x220] sm:$0xff] %v219_v44  ;;  %476 = vst [vmem:[#allocation5 + $0x228] sm:$0xff] %v220_v45  ;;  %v83_v44 = vld [vmem:[#allocation2 + $0x1e0] sm:$0xff]  ;;  %v84_v45 = vld [vmem:[#allocation2 + $0x1e8] sm:$0xff] }
  0x39   :  { %477 = vst [vmem:[#allocation5 + $0x230] sm:$0xff] %v221_v46  ;;  %478 = vst [vmem:[#allocation5 + $0x238] sm:$0xff] %v222_v47  ;;  %v263_v46 = vunpack.c.l.bf16 %v79_v32  ;;  %v264_v47 = vunpack.c.h.bf16 %v79_v32  ;;  %v273_v60 = vunpack.c.l.bf16 %v84_v45  ;;  %v274_v61 = vunpack.c.h.bf16 %v84_v45 }
  0x3a   :  { %479 = vst [vmem:[#allocation5 + $0x240] sm:$0xff] %v223_v50  ;;  %480 = vst [vmem:[#allocation5 + $0x248] sm:$0xff] %v224_v51  ;;  %v85_v50 = vld [vmem:[#allocation2 + $0x1f0] sm:$0xff]  ;;  %v86_v51 = vld [vmem:[#allocation2 + $0x1f8] sm:$0xff] }
  0x3b   :  { %481 = vst [vmem:[#allocation5 + $0x250] sm:$0xff] %v225_v52  ;;  %482 = vst [vmem:[#allocation5 + $0x258] sm:$0xff] %v226_v53  ;;  %v267_v52 = vunpack.c.l.bf16 %v81_v38  ;;  %v268_v53 = vunpack.c.h.bf16 %v81_v38  ;;  %v277_v2 = vunpack.c.l.bf16 %v86_v51  ;;  %v278_v3 = vunpack.c.h.bf16 %v86_v51 }
  0x3c   :  { %483 = vst [vmem:[#allocation5 + $0x260] sm:$0xff] %v227_v56  ;;  %484 = vst [vmem:[#allocation5 + $0x268] sm:$0xff] %v228_v57  ;;  %v87_v56 = vld [vmem:[#allocation2 + $0x200] sm:$0xff]  ;;  %v88_v57 = vld [vmem:[#allocation2 + $0x208] sm:$0xff] }
  0x3d   :  { %485 = vst [vmem:[#allocation5 + $0x270] sm:$0xff] %v229_v58  ;;  %486 = vst [vmem:[#allocation5 + $0x278] sm:$0xff] %v230_v59  ;;  %v271_v58 = vunpack.c.l.bf16 %v83_v44  ;;  %v272_v59 = vunpack.c.h.bf16 %v83_v44  ;;  %v281_v8 = vunpack.c.l.bf16 %v88_v57  ;;  %v282_v9 = vunpack.c.h.bf16 %v88_v57 }
  0x3e   :  { %487 = vst [vmem:[#allocation5 + $0x280] sm:$0xff] %v231_v62  ;;  %488 = vst [vmem:[#allocation5 + $0x288] sm:$0xff] %v232_v63  ;;  %v89_v62 = vld [vmem:[#allocation2 + $0x210] sm:$0xff]  ;;  %v90_v63 = vld [vmem:[#allocation2 + $0x218] sm:$0xff] }
  0x3f   :  { %489 = vst [vmem:[#allocation5 + $0x290] sm:$0xff] %v233_v0  ;;  %490 = vst [vmem:[#allocation5 + $0x298] sm:$0xff] %v234_v1  ;;  %v275_v0 = vunpack.c.l.bf16 %v85_v50  ;;  %v276_v1 = vunpack.c.h.bf16 %v85_v50  ;;  %v285_v14 = vunpack.c.l.bf16 %v90_v63  ;;  %v286_v15 = vunpack.c.h.bf16 %v90_v63 }
  0x40   :  { %491 = vst [vmem:[#allocation5 + $0x2a0] sm:$0xff] %v235_v4  ;;  %492 = vst [vmem:[#allocation5 + $0x2a8] sm:$0xff] %v236_v5  ;;  %v91_v4 = vld [vmem:[#allocation2 + $0x220] sm:$0xff]  ;;  %v92_v5 = vld [vmem:[#allocation2 + $0x228] sm:$0xff] }
  0x41   :  { %493 = vst [vmem:[#allocation5 + $0x2b0] sm:$0xff] %v237_v6  ;;  %494 = vst [vmem:[#allocation5 + $0x2b8] sm:$0xff] %v238_v7  ;;  %v279_v6 = vunpack.c.l.bf16 %v87_v56  ;;  %v280_v7 = vunpack.c.h.bf16 %v87_v56  ;;  %v289_v20 = vunpack.c.l.bf16 %v92_v5  ;;  %v290_v21 = vunpack.c.h.bf16 %v92_v5 }
  0x42   :  { %495 = vst [vmem:[#allocation5 + $0x2c0] sm:$0xff] %v239_v10  ;;  %496 = vst [vmem:[#allocation5 + $0x2c8] sm:$0xff] %v240_v11  ;;  %v93_v10 = vld [vmem:[#allocation2 + $0x230] sm:$0xff]  ;;  %v94_v11 = vld [vmem:[#allocation2 + $0x238] sm:$0xff] }
  0x43   :  { %497 = vst [vmem:[#allocation5 + $0x2d0] sm:$0xff] %v241_v12  ;;  %498 = vst [vmem:[#allocation5 + $0x2d8] sm:$0xff] %v242_v13  ;;  %v283_v12 = vunpack.c.l.bf16 %v89_v62  ;;  %v284_v13 = vunpack.c.h.bf16 %v89_v62  ;;  %v293_v26 = vunpack.c.l.bf16 %v94_v11  ;;  %v294_v27 = vunpack.c.h.bf16 %v94_v11 }
  0x44   :  { %499 = vst [vmem:[#allocation5 + $0x2e0] sm:$0xff] %v243_v16  ;;  %500 = vst [vmem:[#allocation5 + $0x2e8] sm:$0xff] %v244_v17  ;;  %v95_v16 = vld [vmem:[#allocation2 + $0x240] sm:$0xff]  ;;  %v96_v17 = vld [vmem:[#allocation2 + $0x248] sm:$0xff] }
  0x45   :  { %501 = vst [vmem:[#allocation5 + $0x2f0] sm:$0xff] %v245_v18  ;;  %502 = vst [vmem:[#allocation5 + $0x2f8] sm:$0xff] %v246_v19  ;;  %v287_v18 = vunpack.c.l.bf16 %v91_v4  ;;  %v288_v19 = vunpack.c.h.bf16 %v91_v4  ;;  %v297_v32 = vunpack.c.l.bf16 %v96_v17  ;;  %v298_v33 = vunpack.c.h.bf16 %v96_v17 }
  0x46   :  { %503 = vst [vmem:[#allocation5 + $0x300] sm:$0xff] %v247_v22  ;;  %504 = vst [vmem:[#allocation5 + $0x308] sm:$0xff] %v248_v23  ;;  %v97_v22 = vld [vmem:[#allocation2 + $0x250] sm:$0xff]  ;;  %v98_v23 = vld [vmem:[#allocation2 + $0x258] sm:$0xff] }
  0x47   :  { %505 = vst [vmem:[#allocation5 + $0x310] sm:$0xff] %v249_v24  ;;  %506 = vst [vmem:[#allocation5 + $0x318] sm:$0xff] %v250_v25  ;;  %v291_v24 = vunpack.c.l.bf16 %v93_v10  ;;  %v292_v25 = vunpack.c.h.bf16 %v93_v10  ;;  %v301_v38 = vunpack.c.l.bf16 %v98_v23  ;;  %v302_v39 = vunpack.c.h.bf16 %v98_v23 }
  0x48   :  { %507 = vst [vmem:[#allocation5 + $0x320] sm:$0xff] %v251_v28  ;;  %508 = vst [vmem:[#allocation5 + $0x328] sm:$0xff] %v252_v29  ;;  %v99_v28 = vld [vmem:[#allocation2 + $0x260] sm:$0xff]  ;;  %v100_v29 = vld [vmem:[#allocation2 + $0x268] sm:$0xff] }
  0x49   :  { %509 = vst [vmem:[#allocation5 + $0x330] sm:$0xff] %v253_v30  ;;  %510 = vst [vmem:[#allocation5 + $0x338] sm:$0xff] %v254_v31  ;;  %v295_v30 = vunpack.c.l.bf16 %v95_v16  ;;  %v296_v31 = vunpack.c.h.bf16 %v95_v16  ;;  %v305_v44 = vunpack.c.l.bf16 %v100_v29  ;;  %v306_v45 = vunpack.c.h.bf16 %v100_v29 }
  0x4a   :  { %511 = vst [vmem:[#allocation5 + $0x340] sm:$0xff] %v255_v34  ;;  %512 = vst [vmem:[#allocation5 + $0x348] sm:$0xff] %v256_v35  ;;  %v101_v34 = vld [vmem:[#allocation2 + $0x270] sm:$0xff]  ;;  %v102_v35 = vld [vmem:[#allocation2 + $0x278] sm:$0xff] }
  0x4b   :  { %513 = vst [vmem:[#allocation5 + $0x350] sm:$0xff] %v257_v36  ;;  %514 = vst [vmem:[#allocation5 + $0x358] sm:$0xff] %v258_v37  ;;  %v299_v36 = vunpack.c.l.bf16 %v97_v22  ;;  %v300_v37 = vunpack.c.h.bf16 %v97_v22  ;;  %v309_v50 = vunpack.c.l.bf16 %v102_v35  ;;  %v310_v51 = vunpack.c.h.bf16 %v102_v35 }
  0x4c   :  { %515 = vst [vmem:[#allocation5 + $0x360] sm:$0xff] %v259_v40  ;;  %516 = vst [vmem:[#allocation5 + $0x368] sm:$0xff] %v260_v41  ;;  %v103_v40 = vld [vmem:[#allocation2 + $0x280] sm:$0xff]  ;;  %v104_v41 = vld [vmem:[#allocation2 + $0x288] sm:$0xff] }
  0x4d   :  { %517 = vst [vmem:[#allocation5 + $0x370] sm:$0xff] %v261_v42  ;;  %518 = vst [vmem:[#allocation5 + $0x378] sm:$0xff] %v262_v43  ;;  %v303_v42 = vunpack.c.l.bf16 %v99_v28  ;;  %v304_v43 = vunpack.c.h.bf16 %v99_v28  ;;  %v313_v56 = vunpack.c.l.bf16 %v104_v41  ;;  %v314_v57 = vunpack.c.h.bf16 %v104_v41 }
  0x4e   :  { %519 = vst [vmem:[#allocation5 + $0x380] sm:$0xff] %v263_v46  ;;  %520 = vst [vmem:[#allocation5 + $0x388] sm:$0xff] %v264_v47  ;;  %v105_v46 = vld [vmem:[#allocation2 + $0x290] sm:$0xff]  ;;  %v106_v47 = vld [vmem:[#allocation2 + $0x298] sm:$0xff] }
  0x4f   :  { %521 = vst [vmem:[#allocation5 + $0x390] sm:$0xff] %v265_v48  ;;  %522 = vst [vmem:[#allocation5 + $0x398] sm:$0xff] %v266_v49  ;;  %v307_v48 = vunpack.c.l.bf16 %v101_v34  ;;  %v308_v49 = vunpack.c.h.bf16 %v101_v34  ;;  %v317_v62 = vunpack.c.l.bf16 %v106_v47  ;;  %v318_v63 = vunpack.c.h.bf16 %v106_v47 }
  0x50   :  { %523 = vst [vmem:[#allocation5 + $0x3a0] sm:$0xff] %v267_v52  ;;  %524 = vst [vmem:[#allocation5 + $0x3a8] sm:$0xff] %v268_v53  ;;  %v107_v52 = vld [vmem:[#allocation2 + $0x2a0] sm:$0xff]  ;;  %v108_v53 = vld [vmem:[#allocation2 + $0x2a8] sm:$0xff] }
  0x51   :  { %525 = vst [vmem:[#allocation5 + $0x3b0] sm:$0xff] %v269_v54  ;;  %526 = vst [vmem:[#allocation5 + $0x3b8] sm:$0xff] %v270_v55  ;;  %v311_v54 = vunpack.c.l.bf16 %v103_v40  ;;  %v312_v55 = vunpack.c.h.bf16 %v103_v40  ;;  %v321_v4 = vunpack.c.l.bf16 %v108_v53  ;;  %v322_v5 = vunpack.c.h.bf16 %v108_v53 }
  0x52   :  { %527 = vst [vmem:[#allocation5 + $0x3c0] sm:$0xff] %v271_v58  ;;  %528 = vst [vmem:[#allocation5 + $0x3c8] sm:$0xff] %v272_v59  ;;  %v109_v58 = vld [vmem:[#allocation2 + $0x2b0] sm:$0xff]  ;;  %v110_v59 = vld [vmem:[#allocation2 + $0x2b8] sm:$0xff] }
  0x53   :  { %529 = vst [vmem:[#allocation5 + $0x3d0] sm:$0xff] %v273_v60  ;;  %530 = vst [vmem:[#allocation5 + $0x3d8] sm:$0xff] %v274_v61  ;;  %v315_v60 = vunpack.c.l.bf16 %v105_v46  ;;  %v316_v61 = vunpack.c.h.bf16 %v105_v46  ;;  %v325_v10 = vunpack.c.l.bf16 %v110_v59  ;;  %v326_v11 = vunpack.c.h.bf16 %v110_v59 }
  0x54   :  { %531 = vst [vmem:[#allocation5 + $0x3e0] sm:$0xff] %v275_v0  ;;  %532 = vst [vmem:[#allocation5 + $0x3e8] sm:$0xff] %v276_v1  ;;  %v111_v0 = vld [vmem:[#allocation2 + $0x2c0] sm:$0xff]  ;;  %v112_v1 = vld [vmem:[#allocation2 + $0x2c8] sm:$0xff] }
  0x55   :  { %533 = vst [vmem:[#allocation5 + $0x3f0] sm:$0xff] %v277_v2  ;;  %534 = vst [vmem:[#allocation5 + $0x3f8] sm:$0xff] %v278_v3  ;;  %v319_v2 = vunpack.c.l.bf16 %v107_v52  ;;  %v320_v3 = vunpack.c.h.bf16 %v107_v52  ;;  %v329_v16 = vunpack.c.l.bf16 %v112_v1  ;;  %v330_v17 = vunpack.c.h.bf16 %v112_v1 }
  0x56   :  { %535 = vst [vmem:[#allocation5 + $0x400] sm:$0xff] %v279_v6  ;;  %536 = vst [vmem:[#allocation5 + $0x408] sm:$0xff] %v280_v7  ;;  %v113_v6 = vld [vmem:[#allocation2 + $0x2d0] sm:$0xff]  ;;  %v114_v7 = vld [vmem:[#allocation2 + $0x2d8] sm:$0xff] }
  0x57   :  { %537 = vst [vmem:[#allocation5 + $0x410] sm:$0xff] %v281_v8  ;;  %538 = vst [vmem:[#allocation5 + $0x418] sm:$0xff] %v282_v9  ;;  %v323_v8 = vunpack.c.l.bf16 %v109_v58  ;;  %v324_v9 = vunpack.c.h.bf16 %v109_v58  ;;  %v333_v22 = vunpack.c.l.bf16 %v114_v7  ;;  %v334_v23 = vunpack.c.h.bf16 %v114_v7 }
  0x58   :  { %539 = vst [vmem:[#allocation5 + $0x420] sm:$0xff] %v283_v12  ;;  %540 = vst [vmem:[#allocation5 + $0x428] sm:$0xff] %v284_v13  ;;  %v115_v12 = vld [vmem:[#allocation2 + $0x2e0] sm:$0xff]  ;;  %v116_v13 = vld [vmem:[#allocation2 + $0x2e8] sm:$0xff] }
  0x59   :  { %541 = vst [vmem:[#allocation5 + $0x430] sm:$0xff] %v285_v14  ;;  %542 = vst [vmem:[#allocation5 + $0x438] sm:$0xff] %v286_v15  ;;  %v327_v14 = vunpack.c.l.bf16 %v111_v0  ;;  %v328_v15 = vunpack.c.h.bf16 %v111_v0  ;;  %v337_v28 = vunpack.c.l.bf16 %v116_v13  ;;  %v338_v29 = vunpack.c.h.bf16 %v116_v13 }
  0x5a   :  { %543 = vst [vmem:[#allocation5 + $0x440] sm:$0xff] %v287_v18  ;;  %544 = vst [vmem:[#allocation5 + $0x448] sm:$0xff] %v288_v19  ;;  %v117_v18 = vld [vmem:[#allocation2 + $0x2f0] sm:$0xff]  ;;  %v118_v19 = vld [vmem:[#allocation2 + $0x2f8] sm:$0xff] }
  0x5b   :  { %545 = vst [vmem:[#allocation5 + $0x450] sm:$0xff] %v289_v20  ;;  %546 = vst [vmem:[#allocation5 + $0x458] sm:$0xff] %v290_v21  ;;  %v331_v20 = vunpack.c.l.bf16 %v113_v6  ;;  %v332_v21 = vunpack.c.h.bf16 %v113_v6  ;;  %v341_v34 = vunpack.c.l.bf16 %v118_v19  ;;  %v342_v35 = vunpack.c.h.bf16 %v118_v19 }
  0x5c   :  { %547 = vst [vmem:[#allocation5 + $0x460] sm:$0xff] %v291_v24  ;;  %548 = vst [vmem:[#allocation5 + $0x468] sm:$0xff] %v292_v25  ;;  %v119_v24 = vld [vmem:[#allocation2 + $0x300] sm:$0xff]  ;;  %v120_v25 = vld [vmem:[#allocation2 + $0x308] sm:$0xff] }
  0x5d   :  { %549 = vst [vmem:[#allocation5 + $0x470] sm:$0xff] %v293_v26  ;;  %550 = vst [vmem:[#allocation5 + $0x478] sm:$0xff] %v294_v27  ;;  %v335_v26 = vunpack.c.l.bf16 %v115_v12  ;;  %v336_v27 = vunpack.c.h.bf16 %v115_v12  ;;  %v345_v40 = vunpack.c.l.bf16 %v120_v25  ;;  %v346_v41 = vunpack.c.h.bf16 %v120_v25 }
  0x5e   :  { %551 = vst [vmem:[#allocation5 + $0x480] sm:$0xff] %v295_v30  ;;  %552 = vst [vmem:[#allocation5 + $0x488] sm:$0xff] %v296_v31  ;;  %v121_v30 = vld [vmem:[#allocation2 + $0x310] sm:$0xff]  ;;  %v122_v31 = vld [vmem:[#allocation2 + $0x318] sm:$0xff] }
  0x5f   :  { %553 = vst [vmem:[#allocation5 + $0x490] sm:$0xff] %v297_v32  ;;  %554 = vst [vmem:[#allocation5 + $0x498] sm:$0xff] %v298_v33  ;;  %v339_v32 = vunpack.c.l.bf16 %v117_v18  ;;  %v340_v33 = vunpack.c.h.bf16 %v117_v18  ;;  %v349_v46 = vunpack.c.l.bf16 %v122_v31  ;;  %v350_v47 = vunpack.c.h.bf16 %v122_v31 }
  0x60   :  { %555 = vst [vmem:[#allocation5 + $0x4a0] sm:$0xff] %v299_v36  ;;  %556 = vst [vmem:[#allocation5 + $0x4a8] sm:$0xff] %v300_v37  ;;  %v123_v36 = vld [vmem:[#allocation2 + $0x320] sm:$0xff]  ;;  %v124_v37 = vld [vmem:[#allocation2 + $0x328] sm:$0xff] }
  0x61   :  { %557 = vst [vmem:[#allocation5 + $0x4b0] sm:$0xff] %v301_v38  ;;  %558 = vst [vmem:[#allocation5 + $0x4b8] sm:$0xff] %v302_v39  ;;  %v343_v38 = vunpack.c.l.bf16 %v119_v24  ;;  %v344_v39 = vunpack.c.h.bf16 %v119_v24  ;;  %v353_v52 = vunpack.c.l.bf16 %v124_v37  ;;  %v354_v53 = vunpack.c.h.bf16 %v124_v37 }
  0x62   :  { %559 = vst [vmem:[#allocation5 + $0x4c0] sm:$0xff] %v303_v42  ;;  %560 = vst [vmem:[#allocation5 + $0x4c8] sm:$0xff] %v304_v43  ;;  %v125_v42 = vld [vmem:[#allocation2 + $0x330] sm:$0xff]  ;;  %v126_v43 = vld [vmem:[#allocation2 + $0x338] sm:$0xff] }
  0x63   :  { %561 = vst [vmem:[#allocation5 + $0x4d0] sm:$0xff] %v305_v44  ;;  %562 = vst [vmem:[#allocation5 + $0x4d8] sm:$0xff] %v306_v45  ;;  %v347_v44 = vunpack.c.l.bf16 %v121_v30  ;;  %v348_v45 = vunpack.c.h.bf16 %v121_v30  ;;  %v357_v58 = vunpack.c.l.bf16 %v126_v43  ;;  %v358_v59 = vunpack.c.h.bf16 %v126_v43 }
  0x64   :  { %563 = vst [vmem:[#allocation5 + $0x4e0] sm:$0xff] %v307_v48  ;;  %564 = vst [vmem:[#allocation5 + $0x4e8] sm:$0xff] %v308_v49  ;;  %v127_v48 = vld [vmem:[#allocation2 + $0x340] sm:$0xff]  ;;  %v128_v49 = vld [vmem:[#allocation2 + $0x348] sm:$0xff] }
  0x65   :  { %565 = vst [vmem:[#allocation5 + $0x4f0] sm:$0xff] %v309_v50  ;;  %566 = vst [vmem:[#allocation5 + $0x4f8] sm:$0xff] %v310_v51  ;;  %v351_v50 = vunpack.c.l.bf16 %v123_v36  ;;  %v352_v51 = vunpack.c.h.bf16 %v123_v36  ;;  %v361_v0 = vunpack.c.l.bf16 %v128_v49  ;;  %v362_v1 = vunpack.c.h.bf16 %v128_v49 }
  0x66   :  { %567 = vst [vmem:[#allocation5 + $0x500] sm:$0xff] %v311_v54  ;;  %568 = vst [vmem:[#allocation5 + $0x508] sm:$0xff] %v312_v55  ;;  %v129_v54 = vld [vmem:[#allocation2 + $0x350] sm:$0xff]  ;;  %v130_v55 = vld [vmem:[#allocation2 + $0x358] sm:$0xff] }
  0x67   :  { %569 = vst [vmem:[#allocation5 + $0x510] sm:$0xff] %v313_v56  ;;  %570 = vst [vmem:[#allocation5 + $0x518] sm:$0xff] %v314_v57  ;;  %v355_v56 = vunpack.c.l.bf16 %v125_v42  ;;  %v356_v57 = vunpack.c.h.bf16 %v125_v42  ;;  %v365_v6 = vunpack.c.l.bf16 %v130_v55  ;;  %v366_v7 = vunpack.c.h.bf16 %v130_v55 }
  0x68   :  { %571 = vst [vmem:[#allocation5 + $0x520] sm:$0xff] %v315_v60  ;;  %572 = vst [vmem:[#allocation5 + $0x528] sm:$0xff] %v316_v61  ;;  %v131_v60 = vld [vmem:[#allocation2 + $0x360] sm:$0xff]  ;;  %v132_v61 = vld [vmem:[#allocation2 + $0x368] sm:$0xff] }
  0x69   :  { %573 = vst [vmem:[#allocation5 + $0x530] sm:$0xff] %v317_v62  ;;  %574 = vst [vmem:[#allocation5 + $0x538] sm:$0xff] %v318_v63  ;;  %v359_v62 = vunpack.c.l.bf16 %v127_v48  ;;  %v360_v63 = vunpack.c.h.bf16 %v127_v48  ;;  %v369_v12 = vunpack.c.l.bf16 %v132_v61  ;;  %v370_v13 = vunpack.c.h.bf16 %v132_v61 }
  0x6a   :  { %575 = vst [vmem:[#allocation5 + $0x540] sm:$0xff] %v319_v2  ;;  %576 = vst [vmem:[#allocation5 + $0x548] sm:$0xff] %v320_v3  ;;  %v133_v2 = vld [vmem:[#allocation2 + $0x370] sm:$0xff]  ;;  %v134_v3 = vld [vmem:[#allocation2 + $0x378] sm:$0xff] }
  0x6b   :  { %577 = vst [vmem:[#allocation5 + $0x550] sm:$0xff] %v321_v4  ;;  %578 = vst [vmem:[#allocation5 + $0x558] sm:$0xff] %v322_v5  ;;  %v363_v4 = vunpack.c.l.bf16 %v129_v54  ;;  %v364_v5 = vunpack.c.h.bf16 %v129_v54  ;;  %v373_v18 = vunpack.c.l.bf16 %v134_v3  ;;  %v374_v19 = vunpack.c.h.bf16 %v134_v3 }
  0x6c   :  { %579 = vst [vmem:[#allocation5 + $0x560] sm:$0xff] %v323_v8  ;;  %580 = vst [vmem:[#allocation5 + $0x568] sm:$0xff] %v324_v9  ;;  %v135_v8 = vld [vmem:[#allocation2 + $0x380] sm:$0xff]  ;;  %v136_v9 = vld [vmem:[#allocation2 + $0x388] sm:$0xff] }
  0x6d   :  { %581 = vst [vmem:[#allocation5 + $0x570] sm:$0xff] %v325_v10  ;;  %582 = vst [vmem:[#allocation5 + $0x578] sm:$0xff] %v326_v11  ;;  %v367_v10 = vunpack.c.l.bf16 %v131_v60  ;;  %v368_v11 = vunpack.c.h.bf16 %v131_v60  ;;  %v377_v24 = vunpack.c.l.bf16 %v136_v9  ;;  %v378_v25 = vunpack.c.h.bf16 %v136_v9 }
  0x6e   :  { %583 = vst [vmem:[#allocation5 + $0x580] sm:$0xff] %v327_v14  ;;  %584 = vst [vmem:[#allocation5 + $0x588] sm:$0xff] %v328_v15  ;;  %v137_v14 = vld [vmem:[#allocation2 + $0x390] sm:$0xff]  ;;  %v138_v15 = vld [vmem:[#allocation2 + $0x398] sm:$0xff] }
  0x6f   :  { %585 = vst [vmem:[#allocation5 + $0x590] sm:$0xff] %v329_v16  ;;  %586 = vst [vmem:[#allocation5 + $0x598] sm:$0xff] %v330_v17  ;;  %v371_v16 = vunpack.c.l.bf16 %v133_v2  ;;  %v372_v17 = vunpack.c.h.bf16 %v133_v2  ;;  %v381_v30 = vunpack.c.l.bf16 %v138_v15  ;;  %v382_v31 = vunpack.c.h.bf16 %v138_v15 }
  0x70   :  { %587 = vst [vmem:[#allocation5 + $0x5a0] sm:$0xff] %v331_v20  ;;  %588 = vst [vmem:[#allocation5 + $0x5a8] sm:$0xff] %v332_v21  ;;  %v139_v20 = vld [vmem:[#allocation2 + $0x3a0] sm:$0xff]  ;;  %v140_v21 = vld [vmem:[#allocation2 + $0x3a8] sm:$0xff] }
  0x71   :  { %589 = vst [vmem:[#allocation5 + $0x5b0] sm:$0xff] %v333_v22  ;;  %590 = vst [vmem:[#allocation5 + $0x5b8] sm:$0xff] %v334_v23  ;;  %v375_v22 = vunpack.c.l.bf16 %v135_v8  ;;  %v376_v23 = vunpack.c.h.bf16 %v135_v8  ;;  %v385_v36 = vunpack.c.l.bf16 %v140_v21  ;;  %v386_v37 = vunpack.c.h.bf16 %v140_v21 }
  0x72   :  { %591 = vst [vmem:[#allocation5 + $0x5c0] sm:$0xff] %v335_v26  ;;  %592 = vst [vmem:[#allocation5 + $0x5c8] sm:$0xff] %v336_v27  ;;  %v141_v26 = vld [vmem:[#allocation2 + $0x3b0] sm:$0xff]  ;;  %v142_v27 = vld [vmem:[#allocation2 + $0x3b8] sm:$0xff] }
  0x73   :  { %593 = vst [vmem:[#allocation5 + $0x5d0] sm:$0xff] %v337_v28  ;;  %594 = vst [vmem:[#allocation5 + $0x5d8] sm:$0xff] %v338_v29  ;;  %v379_v28 = vunpack.c.l.bf16 %v137_v14  ;;  %v380_v29 = vunpack.c.h.bf16 %v137_v14  ;;  %v389_v42 = vunpack.c.l.bf16 %v142_v27  ;;  %v390_v43 = vunpack.c.h.bf16 %v142_v27 }
  0x74   :  { %595 = vst [vmem:[#allocation5 + $0x5e0] sm:$0xff] %v339_v32  ;;  %596 = vst [vmem:[#allocation5 + $0x5e8] sm:$0xff] %v340_v33  ;;  %v143_v32 = vld [vmem:[#allocation2 + $0x3c0] sm:$0xff]  ;;  %v144_v33 = vld [vmem:[#allocation2 + $0x3c8] sm:$0xff] }
  0x75   :  { %597 = vst [vmem:[#allocation5 + $0x5f0] sm:$0xff] %v341_v34  ;;  %598 = vst [vmem:[#allocation5 + $0x5f8] sm:$0xff] %v342_v35  ;;  %v383_v34 = vunpack.c.l.bf16 %v139_v20  ;;  %v384_v35 = vunpack.c.h.bf16 %v139_v20  ;;  %v393_v48 = vunpack.c.l.bf16 %v144_v33  ;;  %v394_v49 = vunpack.c.h.bf16 %v144_v33 }
  0x76   :  { %599 = vst [vmem:[#allocation5 + $0x600] sm:$0xff] %v343_v38  ;;  %600 = vst [vmem:[#allocation5 + $0x608] sm:$0xff] %v344_v39  ;;  %v145_v38 = vld [vmem:[#allocation2 + $0x3d0] sm:$0xff]  ;;  %v146_v39 = vld [vmem:[#allocation2 + $0x3d8] sm:$0xff] }
  0x77   :  { %601 = vst [vmem:[#allocation5 + $0x610] sm:$0xff] %v345_v40  ;;  %602 = vst [vmem:[#allocation5 + $0x618] sm:$0xff] %v346_v41  ;;  %v387_v40 = vunpack.c.l.bf16 %v141_v26  ;;  %v388_v41 = vunpack.c.h.bf16 %v141_v26  ;;  %v397_v54 = vunpack.c.l.bf16 %v146_v39  ;;  %v398_v55 = vunpack.c.h.bf16 %v146_v39 }
  0x78   :  { %603 = vst [vmem:[#allocation5 + $0x620] sm:$0xff] %v347_v44  ;;  %604 = vst [vmem:[#allocation5 + $0x628] sm:$0xff] %v348_v45  ;;  %v147_v44 = vld [vmem:[#allocation2 + $0x3e0] sm:$0xff]  ;;  %v148_v45 = vld [vmem:[#allocation2 + $0x3e8] sm:$0xff] }
  0x79   :  { %605 = vst [vmem:[#allocation5 + $0x630] sm:$0xff] %v349_v46  ;;  %606 = vst [vmem:[#allocation5 + $0x638] sm:$0xff] %v350_v47  ;;  %v391_v46 = vunpack.c.l.bf16 %v143_v32  ;;  %v392_v47 = vunpack.c.h.bf16 %v143_v32 }
  0x7a   :  { %607 = vst [vmem:[#allocation5 + $0x640] sm:$0xff] %v351_v50  ;;  %608 = vst [vmem:[#allocation5 + $0x648] sm:$0xff] %v352_v51  ;;  %v149_v50 = vld [vmem:[#allocation2 + $0x3f0] sm:$0xff]  ;;  %v150_v51 = vld [vmem:[#allocation2 + $0x3f8] sm:$0xff] }
  0x7b   :  { %609 = vst [vmem:[#allocation5 + $0x650] sm:$0xff] %v353_v52  ;;  %610 = vst [vmem:[#allocation5 + $0x658] sm:$0xff] %v354_v53  ;;  %v395_v52 = vunpack.c.l.bf16 %v145_v38  ;;  %v396_v53 = vunpack.c.h.bf16 %v145_v38  ;;  %v403_v60 = vunpack.c.l.bf16 %v149_v50  ;;  %v404_v61 = vunpack.c.h.bf16 %v149_v50 }
  0x7c   :  { %611 = vst [vmem:[#allocation5 + $0x660] sm:$0xff] %v355_v56  ;;  %612 = vst [vmem:[#allocation5 + $0x668] sm:$0xff] %v356_v57  ;;  %v399_v56 = vunpack.c.l.bf16 %v147_v44  ;;  %v400_v57 = vunpack.c.h.bf16 %v147_v44 }
  0x7d   :  { %613 = vst [vmem:[#allocation5 + $0x670] sm:$0xff] %v357_v58  ;;  %614 = vst [vmem:[#allocation5 + $0x678] sm:$0xff] %v358_v59  ;;  %v401_v58 = vunpack.c.l.bf16 %v148_v45  ;;  %v402_v59 = vunpack.c.h.bf16 %v148_v45 }
  0x7e   :  { %615 = vst [vmem:[#allocation5 + $0x680] sm:$0xff] %v359_v62  ;;  %616 = vst [vmem:[#allocation5 + $0x688] sm:$0xff] %v360_v63  ;;  %v405_v62 = vunpack.c.l.bf16 %v150_v51  ;;  %v406_v63 = vunpack.c.h.bf16 %v150_v51 }
  0x7f   :  { %617 = vst [vmem:[#allocation5 + $0x690] sm:$0xff] %v361_v0  ;;  %618 = vst [vmem:[#allocation5 + $0x698] sm:$0xff] %v362_v1 }
  0x80   :  { %619 = vst [vmem:[#allocation5 + $0x6a0] sm:$0xff] %v363_v4  ;;  %620 = vst [vmem:[#allocation5 + $0x6a8] sm:$0xff] %v364_v5 }
  0x81   :  { %621 = vst [vmem:[#allocation5 + $0x6b0] sm:$0xff] %v365_v6  ;;  %622 = vst [vmem:[#allocation5 + $0x6b8] sm:$0xff] %v366_v7 }
  0x82   :  { %623 = vst [vmem:[#allocation5 + $0x6c0] sm:$0xff] %v367_v10  ;;  %624 = vst [vmem:[#allocation5 + $0x6c8] sm:$0xff] %v368_v11 }
  0x83   :  { %625 = vst [vmem:[#allocation5 + $0x6d0] sm:$0xff] %v369_v12  ;;  %626 = vst [vmem:[#allocation5 + $0x6d8] sm:$0xff] %v370_v13 }
  0x84   :  { %627 = vst [vmem:[#allocation5 + $0x6e0] sm:$0xff] %v371_v16  ;;  %628 = vst [vmem:[#allocation5 + $0x6e8] sm:$0xff] %v372_v17 }
  0x85   :  { %629 = vst [vmem:[#allocation5 + $0x6f0] sm:$0xff] %v373_v18  ;;  %630 = vst [vmem:[#allocation5 + $0x6f8] sm:$0xff] %v374_v19 }
  0x86   :  { %631 = vst [vmem:[#allocation5 + $0x700] sm:$0xff] %v375_v22  ;;  %632 = vst [vmem:[#allocation5 + $0x708] sm:$0xff] %v376_v23 }
  0x87   :  { %633 = vst [vmem:[#allocation5 + $0x710] sm:$0xff] %v377_v24  ;;  %634 = vst [vmem:[#allocation5 + $0x718] sm:$0xff] %v378_v25 }
  0x88   :  { %635 = vst [vmem:[#allocation5 + $0x720] sm:$0xff] %v379_v28  ;;  %636 = vst [vmem:[#allocation5 + $0x728] sm:$0xff] %v380_v29 }
  0x89   :  { %637 = vst [vmem:[#allocation5 + $0x730] sm:$0xff] %v381_v30  ;;  %638 = vst [vmem:[#allocation5 + $0x738] sm:$0xff] %v382_v31 }
  0x8a   :  { %639 = vst [vmem:[#allocation5 + $0x740] sm:$0xff] %v383_v34  ;;  %640 = vst [vmem:[#allocation5 + $0x748] sm:$0xff] %v384_v35 }
  0x8b   :  { %641 = vst [vmem:[#allocation5 + $0x750] sm:$0xff] %v385_v36  ;;  %642 = vst [vmem:[#allocation5 + $0x758] sm:$0xff] %v386_v37 }
  0x8c   :  { %643 = vst [vmem:[#allocation5 + $0x760] sm:$0xff] %v387_v40  ;;  %644 = vst [vmem:[#allocation5 + $0x768] sm:$0xff] %v388_v41 }
  0x8d   :  { %645 = vst [vmem:[#allocation5 + $0x770] sm:$0xff] %v389_v42  ;;  %646 = vst [vmem:[#allocation5 + $0x778] sm:$0xff] %v390_v43 }
  0x8e   :  { %647 = vst [vmem:[#allocation5 + $0x780] sm:$0xff] %v391_v46  ;;  %648 = vst [vmem:[#allocation5 + $0x788] sm:$0xff] %v392_v47 }
  0x8f   :  { %649 = vst [vmem:[#allocation5 + $0x790] sm:$0xff] %v393_v48  ;;  %650 = vst [vmem:[#allocation5 + $0x798] sm:$0xff] %v394_v49 }
  0x90   :  { %651 = vst [vmem:[#allocation5 + $0x7a0] sm:$0xff] %v395_v52  ;;  %652 = vst [vmem:[#allocation5 + $0x7a8] sm:$0xff] %v396_v53 }
  0x91   :  { %653 = vst [vmem:[#allocation5 + $0x7b0] sm:$0xff] %v397_v54  ;;  %654 = vst [vmem:[#allocation5 + $0x7b8] sm:$0xff] %v398_v55 }
  0x92   :  { %655 = vst [vmem:[#allocation5 + $0x7c0] sm:$0xff] %v399_v56  ;;  %656 = vst [vmem:[#allocation5 + $0x7c8] sm:$0xff] %v400_v57 }
  0x93   :  { %657 = vst [vmem:[#allocation5 + $0x7d0] sm:$0xff] %v401_v58  ;;  %658 = vst [vmem:[#allocation5 + $0x7d8] sm:$0xff] %v402_v59 }
  0x94   :  { %659 = vst [vmem:[#allocation5 + $0x7e0] sm:$0xff] %v403_v60  ;;  %660 = vst [vmem:[#allocation5 + $0x7e8] sm:$0xff] %v404_v61 }
  0x95   :  { %661 = vst [vmem:[#allocation5 + $0x7f0] sm:$0xff] %v405_v62  ;;  %662 = vst [vmem:[#allocation5 + $0x7f8] sm:$0xff] %v406_v63 }
  0x96   :  { %719 = shalt.err (!%p716_p12)
}
  0x97   :  { %s720_s24 = scalar_lea.hbm %s775_s1, 32768 }
  0x98   :  { %p721_p13 = scmp.ne.s32.totalorder %s775_s1, %s720_s24  ;;  %p724_p0 = scmp.lt.u32.totalorder %s720_s24, %s775_s1 }
  0x9a   :  { %p726_p1 = pnand %p724_p0, %p721_p13 }
  0x9c   :  { %729 = shalt.err (!%p726_p1)
}
  0x9d   :  { %s738_s29 = smov 8192   ;;  %s739_s30 = smov 512  }
  0x9e   :  { %674 = dma.vmem_to_hbm [thread:$0]  %s669_s20, 32768, %s775_s1, [#allocation4], %s738_s29, %s738_s29, %s739_s30  }
  0x9f   :  { %732 = dma.done.wait [#allocation4], 32768  }
  0xa0   :  { %733 = vsyncadd [#allocation4], 4294934528 }
  0xa1   :  { %678 = vsyncpa [#allocation3], 1 }
  0xa2   :  { %679 = vsyncpa [#allocation4], 1 }

</bundles_post_ra>
